<compile_context>
chip_gen: v6e
topology: v6e:2x2x1
jax: 0.10.0
libtpu: 0.0.40
codegen_flags: <defaults>
</compile_context>

<pallas_src>
import functools

import jax
import jax.numpy as jnp
from jax.experimental import pallas as pl
from jax.experimental.pallas import tpu as pltpu

# ----------------------------- configuration --------------------------------
B, C, H, W = 2, 3, 16, 16          # image batch (NCHW, like PyTorch)
NUM_CLASSES = 4
NA = 3                             # anchors per level
NO = NUM_CLASSES + 5               # outputs per anchor (x,y,w,h,obj,cls...)
STRIDES = (4, 8)                   # two detection levels -> 4x4 and 2x2 cells
KP = 0                             # no keypoints

# Padded, vreg-aligned sublane row layout (o-major inside 8-row groups):
#   rows  0.. 2 : x   (anchor 0..2)   } group [0:8]   -> xy decode
#   rows  3.. 5 : y   (anchor 0..2)   }
#   rows  6.. 7 : pad
#   rows  8..10 : w   (anchor 0..2)   } group [8:16]  -> wh decode
#   rows 11..13 : h   (anchor 0..2)   }
#   rows 14..15 : pad
#   rows 16..30 : obj, cls0..cls3     } group [16:32] -> passthrough
#   row  31     : pad
NR = 32                            # padded sublane rows (27 real + 5 pad)
LANE = 128                         # lane alignment for each level's cell block

PIXEL_MEAN = jnp.array([103.53, 116.28, 123.675], jnp.float32)
PIXEL_STD = jnp.array([57.375, 57.12, 58.395], jnp.float32)


def _padded_row(o, a):
    if o == 0:
        return a
    if o == 1:
        return NA + a
    if o == 2:
        return 8 + a
    if o == 3:
        return 8 + NA + a
    return 16 + (o - 4) * NA + a


# ROW_PERM[a*NO + o] = padded sublane row holding (anchor a, channel o)
ROW_PERM = tuple(_padded_row(o, a) for a in range(NA) for o in range(NO))


def _vmem_spec():
    return pl.BlockSpec(memory_space=pltpu.MemorySpace.VMEM)


# ------------------------------ Pallas kernel --------------------------------
def head_decode_kernel(feat_ref, grid_ref, w_ref, b_ref, ar_ref, o_ref,
                       *, level_cells, strides, n_chan):
    """Fused 1x1 detection head (VPU) + YOLO box decode for all levels.

      feat_ref : (C, total_padded)  pooled features, cells lane-dense, each
                                    level's block 128-lane aligned, zero padded
      grid_ref : (8, total_padded)  rows 0..2 = stride*(cx-0.5),
                                    rows 3..5 = stride*(cy-0.5)   (precomputed)
      w_ref    : (L, NR, C)         preprocess-folded conv weights, padded rows
      b_ref    : (L, NR, 1)         preprocess-folded conv bias, padded rows
      ar_ref   : (L, 8, 1)          4*anchor*stride column for the wh group
      o_ref    : (NR, total_padded) decoded predictions (padded row layout)
    """
    off = 0
    for li, (pc, stride) in enumerate(zip(level_cells, strides)):
        p = feat_ref[:, off:off + pc]      # (C, pc)  lane-dense cells
        w = w_ref[li]                      # (NR, C)
        bias = b_ref[li]                   # (NR, 1)

        # 1x1 conv: K=C(=3), N=NR -> VPU broadcast-MACs (far below MXU size).
        # TODO(synk): at real backbone widths (C >= ~64) replace this loop with
        #             jnp.dot(w, p, preferred_element_type=jnp.float32) (MXU).
        head = bias + w[:, 0:1] * p[0:1, :]
        for c in range(1, n_chan):
            head = head + w[:, c:c + 1] * p[c:c + 1, :]

        y = jax.nn.sigmoid(head)           # (NR, pc) -- EUP slot

        # Contiguous 8-aligned sublane groups: no iota/mod/where masks, no
        # redundant xy/wh math on other rows, full unmasked aligned stores.
        g = grid_ref[:, off:off + pc]      # (8, pc) = stride*(grid - 0.5)
        ar = ar_ref[li]                    # (8, 1)  = 4*anchor*stride
        o_ref[0:8, off:off + pc] = y[0:8, :] * (2.0 * float(stride)) + g
        o_ref[8:16, off:off + pc] = y[8:16, :] * y[8:16, :] * ar
        o_ref[16:NR, off:off + pc] = y[16:NR, :]
        # TODO(synk): keypoint decode (head.kp > 0) omitted; KP == 0 here.
        off += pc


# ------------------------------ wrappers (glue) -------------------------------
def pooled_features(images, stride):
    """Backbone stand-in (external YOLO_BACKBONE): avg-pool RAW image to level
    resolution, returned as (C, B*ny*nx) -- channels on sublanes, cells on lanes."""
    b, c, h, w = images.shape
    ny, nx = h // stride, w // stride
    f = images.reshape(b, c, ny, stride, nx, stride).mean(axis=(3, 5))  # (B,C,ny,nx)
    return f.transpose(1, 0, 2, 3).reshape(c, b * ny * nx)


def fold_preprocess_padded(w, b):
    """Fold Yolo.preprocess_image into the 1x1 conv (pooling is linear):
    ((x-mean)/std) @ w + b == x @ (w/std) + (b - (mean/std) @ w),
    then scatter the NA*NO a-major rows into the padded NR-row layout."""
    inv_std = 1.0 / PIXEL_STD
    w_fold = (w * inv_std[:, None]).T                       # (NA*NO, C)
    b_fold = (b - (PIXEL_MEAN * inv_std) @ w).reshape(-1)   # (NA*NO,)
    perm = jnp.asarray(ROW_PERM)
    w_pad = jnp.zeros((NR, w.shape[0]), jnp.float32).at[perm].set(w_fold)
    b_pad = jnp.zeros((NR, 1), jnp.float32).at[perm].set(b_fold[:, None])
    return w_pad, b_pad


def anchor_col(anchors_l, stride):
    """(8,1): rows 0..2 = 4*anchor_w*stride, rows 3..5 = 4*anchor_h*stride."""
    a = jnp.zeros((8, 1), jnp.float32)
    a = a.at[0:NA, 0].set(4.0 * anchors_l[:, 0] * float(stride))
    a = a.at[NA:2 * NA, 0].set(4.0 * anchors_l[:, 1] * float(stride))
    return a


def grid_rows(bsz, ny, nx, stride, padded):
    """(8, padded): rows 0..2 = stride*(cx-0.5), rows 3..5 = stride*(cy-0.5)."""
    yy, xx = jnp.meshgrid(jnp.arange(ny, dtype=jnp.float32),
                          jnp.arange(nx, dtype=jnp.float32), indexing="ij")
    gx = jnp.tile((xx.reshape(-1) - 0.5) * float(stride), bsz)
    gy = jnp.tile((yy.reshape(-1) - 0.5) * float(stride), bsz)
    n = bsz * ny * nx
    g = jnp.zeros((8, padded), jnp.float32)
    g = g.at[0:NA, :n].set(jnp.broadcast_to(gx, (NA, n)))
    g = g.at[NA:2 * NA, :n].set(jnp.broadcast_to(gy, (NA, n)))
    return g


def yolo_forward(images, params):
    """Inference path of Yolo.forward up to the NMS input (torch.cat(z, 1))."""
    images = images.astype(jnp.float32)
    bsz, nchan = images.shape[0], images.shape[1]
    levels = tuple((images.shape[2] // s, images.shape[3] // s, s) for s in STRIDES)
    ncells = [bsz * ny * nx for ny, nx, _ in levels]
    pcells = [-(-n // LANE) * LANE for n in ncells]          # 128-lane aligned
    total = sum(pcells)

    feats, grids = [], []
    for (ny, nx, s), nc, pc in zip(levels, ncells, pcells):
        f = pooled_features(images, s)                       # (C, nc)
        feats.append(jnp.pad(f, ((0, 0), (0, pc - nc))))
        grids.append(grid_rows(bsz, ny, nx, s, pc))
    feat_all = jnp.concatenate(feats, axis=1)                # (C, total)
    grid_all = jnp.concatenate(grids, axis=1)                # (8, total)

    wb = [fold_preprocess_padded(params["w"][li], params["b"][li])
          for li in range(len(STRIDES))]
    w_all = jnp.stack([w for w, _ in wb])                    # (L, NR, C)
    b_all = jnp.stack([b for _, b in wb])                    # (L, NR, 1)
    ar_all = jnp.stack([anchor_col(params["anchors"][li], s)
                        for li, s in enumerate(STRIDES)])    # (L, 8, 1)

    out = pl.pallas_call(
        functools.partial(head_decode_kernel,
                          level_cells=tuple(pcells),
                          strides=STRIDES,
                          n_chan=nchan),
        out_shape=jax.ShapeDtypeStruct((NR, total), jnp.float32),
        in_specs=[_vmem_spec()] * 5,
        out_specs=_vmem_spec(),
    )(feat_all, grid_all, w_all, b_all, ar_all)

    # Strip padding + convert the lane-dense (NR, cells) slab to the PyTorch
    # (B, NA*ny*nx, NO) layout. Kept outside the kernel purely for the
    # reference check; a host-side NMS consumer could take the lane-dense
    # layout directly and skip this transpose entirely.
    perm = jnp.asarray(ROW_PERM)
    zs, off = [], 0
    for (ny, nx, _), nc, pc in zip(levels, ncells, pcells):
        blk = out[perm, off:off + nc]                        # (NA*NO, nc) a-major
        zs.append(blk.reshape(NA, NO, bsz, ny * nx)
                  .transpose(2, 0, 3, 1)
                  .reshape(bsz, NA * ny * nx, NO))
        off += pc
    return jnp.concatenate(zs, axis=1)


# ------------------------------ pure-JAX reference ---------------------------
def yolo_reference(images, params):
    x = (images.astype(jnp.float32) - PIXEL_MEAN[None, :, None, None]) / (
        PIXEL_STD[None, :, None, None]
    )
    z = []
    for li, stride in enumerate(STRIDES):
        b, c, h, w = x.shape
        ny, nx = h // stride, w // stride
        feat = x.reshape(b, c, ny, stride, nx, stride).mean(axis=(3, 5))
        feat = feat.transpose(0, 2, 3, 1)                                  # (B,ny,nx,C)
        out = feat.reshape(b * ny * nx, c) @ params["w"][li] + params["b"][li]
        xh = out.reshape(b, ny, nx, NA, NO).transpose(0, 3, 1, 2, 4)
        yv, xv = jnp.meshgrid(jnp.arange(ny, dtype=jnp.float32),
                              jnp.arange(nx, dtype=jnp.float32), indexing="ij")
        grid = jnp.broadcast_to(jnp.stack([xv, yv], -1)[None], (NA, ny, nx, 2))
        ag = jnp.broadcast_to((params["anchors"][li] * float(stride))[:, None, None, :],
                              (NA, ny, nx, 2))
        y = jax.nn.sigmoid(xh)
        xy = (y[..., 0:2] * 2.0 - 0.5 + grid[None]) * float(stride)
        wh = (y[..., 2:4] * 2.0) ** 2 * ag[None]
        y = jnp.concatenate([xy, wh, y[..., 4:]], axis=-1)
        z.append(y.reshape(b, -1, NO))
    return jnp.concatenate(z, axis=1)


# ----------------------------------- main ------------------------------------
if __name__ == "__main__":
    key = jax.random.PRNGKey(0)
    k_img, k_w0, k_w1, k_b0, k_b1 = jax.random.split(key, 5)

    images = jax.random.uniform(
        k_img, (B, C, H, W), jnp.float32, minval=0.0, maxval=255.0
    )

    params = {
        "w": [
            jax.random.normal(k_w0, (C, NA * NO), jnp.float32) * 0.1,
            jax.random.normal(k_w1, (C, NA * NO), jnp.float32) * 0.1,
        ],
        "b": [
            jax.random.normal(k_b0, (1, NA * NO), jnp.float32) * 0.01,
            jax.random.normal(k_b1, (1, NA * NO), jnp.float32) * 0.01,
        ],
        "anchors": [
            jnp.array([[1.25, 1.625], [2.0, 3.75], [4.125, 2.875]], jnp.float32),
            jnp.array([[1.875, 3.8125], [3.875, 2.8125], [3.6875, 7.4375]],
                      jnp.float32),
        ],
    }

    fwd = jax.jit(yolo_forward)
    out = fwd(images, params)
    out = jax.block_until_ready(out)

    ref = yolo_reference(images, params)
    assert out.shape == (B, NA * (4 * 4 + 2 * 2), NO), out.shape
    assert jnp.allclose(out, ref, atol=1e-4, rtol=1e-4), "mismatch vs reference"

    print("KERNEL_OK")
</pallas_src>

<mosaic_0001>
module attributes {stable_mosaic.version = 11 : i64} {
  func.func @head_decode_kernel(%arg0: memref<3x256xf32, #tpu.memory_space<vmem>>, %arg1: memref<8x256xf32, #tpu.memory_space<vmem>>, %arg2: memref<2x32x3xf32, #tpu.memory_space<vmem>>, %arg3: memref<2x32x1xf32, #tpu.memory_space<vmem>>, %arg4: memref<2x8x1xf32, #tpu.memory_space<vmem>>, %arg5: memref<32x256xf32, #tpu.memory_space<vmem>>) attributes {dimension_semantics = [], scalar_prefetch = 0 : i64, scratch_operands = 0 : i64, tpu.core_type = #tpu.core_type<tc>} {
    %c0 = arith.constant 0 : index
    %c0_0 = arith.constant 0 : index
    %0 = vector.load %arg0[%c0, %c0_0] : memref<3x256xf32, #tpu.memory_space<vmem>>, vector<3x128xf32>
    %c0_1 = arith.constant 0 : index
    %c0_2 = arith.constant 0 : index
    %c0_3 = arith.constant 0 : index
    %1 = vector.load %arg2[%c0_1, %c0_2, %c0_3] : memref<2x32x3xf32, #tpu.memory_space<vmem>>, vector<1x32x3xf32>
    %2 = vector.shape_cast %1 : vector<1x32x3xf32> to vector<32x3xf32>
    %c0_4 = arith.constant 0 : index
    %c0_5 = arith.constant 0 : index
    %c0_6 = arith.constant 0 : index
    %3 = vector.load %arg3[%c0_4, %c0_5, %c0_6] : memref<2x32x1xf32, #tpu.memory_space<vmem>>, vector<1x32x1xf32>
    %4 = vector.shape_cast %3 : vector<1x32x1xf32> to vector<32x1xf32>
    %5 = vector.extract_strided_slice %2 {offsets = [0, 0], sizes = [32, 1], strides = [1, 1]} : vector<32x3xf32> to vector<32x1xf32>
    %6 = vector.extract_strided_slice %0 {offsets = [0, 0], sizes = [1, 128], strides = [1, 1]} : vector<3x128xf32> to vector<1x128xf32>
    %7 = vector.broadcast %5 : vector<32x1xf32> to vector<32x128xf32>
    %8 = vector.broadcast %6 : vector<1x128xf32> to vector<32x128xf32>
    %9 = arith.mulf %7, %8 : vector<32x128xf32>
    %10 = vector.broadcast %4 : vector<32x1xf32> to vector<32x128xf32>
    %11 = arith.addf %10, %9 : vector<32x128xf32>
    %12 = vector.extract_strided_slice %2 {offsets = [0, 1], sizes = [32, 1], strides = [1, 1]} : vector<32x3xf32> to vector<32x1xf32>
    %13 = vector.extract_strided_slice %0 {offsets = [1, 0], sizes = [1, 128], strides = [1, 1]} : vector<3x128xf32> to vector<1x128xf32>
    %14 = vector.broadcast %12 : vector<32x1xf32> to vector<32x128xf32>
    %15 = vector.broadcast %13 : vector<1x128xf32> to vector<32x128xf32>
    %16 = arith.mulf %14, %15 : vector<32x128xf32>
    %17 = arith.addf %11, %16 : vector<32x128xf32>
    %18 = vector.extract_strided_slice %2 {offsets = [0, 2], sizes = [32, 1], strides = [1, 1]} : vector<32x3xf32> to vector<32x1xf32>
    %19 = vector.extract_strided_slice %0 {offsets = [2, 0], sizes = [1, 128], strides = [1, 1]} : vector<3x128xf32> to vector<1x128xf32>
    %20 = vector.broadcast %18 : vector<32x1xf32> to vector<32x128xf32>
    %21 = vector.broadcast %19 : vector<1x128xf32> to vector<32x128xf32>
    %22 = arith.mulf %20, %21 : vector<32x128xf32>
    %23 = arith.addf %17, %22 : vector<32x128xf32>
    %24 = arith.negf %23 : vector<32x128xf32>
    %25 = math.exp %24 : vector<32x128xf32>
    %cst = arith.constant 1.000000e+00 : f32
    %26 = vector.broadcast %cst : f32 to vector<32x128xf32>
    %27 = arith.addf %26, %25 : vector<32x128xf32>
    %28 = arith.divf %26, %27 : vector<32x128xf32>
    %c0_7 = arith.constant 0 : index
    %c0_8 = arith.constant 0 : index
    %29 = vector.load %arg1[%c0_7, %c0_8] : memref<8x256xf32, #tpu.memory_space<vmem>>, vector<8x128xf32>
    %c0_9 = arith.constant 0 : index
    %c0_10 = arith.constant 0 : index
    %c0_11 = arith.constant 0 : index
    %30 = vector.load %arg4[%c0_9, %c0_10, %c0_11] : memref<2x8x1xf32, #tpu.memory_space<vmem>>, vector<1x8x1xf32>
    %31 = vector.shape_cast %30 : vector<1x8x1xf32> to vector<8x1xf32>
    %32 = vector.extract_strided_slice %28 {offsets = [0, 0], sizes = [8, 128], strides = [1, 1]} : vector<32x128xf32> to vector<8x128xf32>
    %cst_12 = arith.constant 8.000000e+00 : f32
    %33 = vector.broadcast %cst_12 : f32 to vector<8x128xf32>
    %34 = arith.mulf %32, %33 : vector<8x128xf32>
    %35 = arith.addf %34, %29 : vector<8x128xf32>
    %c0_13 = arith.constant 0 : index
    %c0_14 = arith.constant 0 : index
    %36 = vector.load %arg5[%c0_13, %c0_14] : memref<32x256xf32, #tpu.memory_space<vmem>>, vector<8x128xf32>
    tpu.vector_store %arg5[%c0_13, %c0_14], %35 {strides = array<i32>} : memref<32x256xf32, #tpu.memory_space<vmem>>, vector<8x128xf32>,
    %37 = vector.extract_strided_slice %28 {offsets = [8, 0], sizes = [8, 128], strides = [1, 1]} : vector<32x128xf32> to vector<8x128xf32>
    %38 = vector.extract_strided_slice %28 {offsets = [8, 0], sizes = [8, 128], strides = [1, 1]} : vector<32x128xf32> to vector<8x128xf32>
    %39 = arith.mulf %37, %38 : vector<8x128xf32>
    %40 = vector.broadcast %31 : vector<8x1xf32> to vector<8x128xf32>
    %41 = arith.mulf %39, %40 : vector<8x128xf32>
    %c8 = arith.constant 8 : index
    %c0_15 = arith.constant 0 : index
    %42 = vector.load %arg5[%c8, %c0_15] : memref<32x256xf32, #tpu.memory_space<vmem>>, vector<8x128xf32>
    tpu.vector_store %arg5[%c8, %c0_15], %41 {strides = array<i32>} : memref<32x256xf32, #tpu.memory_space<vmem>>, vector<8x128xf32>,
    %43 = vector.extract_strided_slice %28 {offsets = [16, 0], sizes = [16, 128], strides = [1, 1]} : vector<32x128xf32> to vector<16x128xf32>
    %c16 = arith.constant 16 : index
    %c0_16 = arith.constant 0 : index
    %44 = vector.load %arg5[%c16, %c0_16] : memref<32x256xf32, #tpu.memory_space<vmem>>, vector<16x128xf32>
    tpu.vector_store %arg5[%c16, %c0_16], %43 {strides = array<i32>} : memref<32x256xf32, #tpu.memory_space<vmem>>, vector<16x128xf32>,
    %c0_17 = arith.constant 0 : index
    %c128 = arith.constant 128 : index
    %45 = vector.load %arg0[%c0_17, %c128] : memref<3x256xf32, #tpu.memory_space<vmem>>, vector<3x128xf32>
    %c1 = arith.constant 1 : index
    %c0_18 = arith.constant 0 : index
    %c0_19 = arith.constant 0 : index
    %46 = vector.load %arg2[%c1, %c0_18, %c0_19] : memref<2x32x3xf32, #tpu.memory_space<vmem>>, vector<1x32x3xf32>
    %47 = vector.shape_cast %46 : vector<1x32x3xf32> to vector<32x3xf32>
    %c1_20 = arith.constant 1 : index
    %c0_21 = arith.constant 0 : index
    %c0_22 = arith.constant 0 : index
    %48 = vector.load %arg3[%c1_20, %c0_21, %c0_22] : memref<2x32x1xf32, #tpu.memory_space<vmem>>, vector<1x32x1xf32>
    %49 = vector.shape_cast %48 : vector<1x32x1xf32> to vector<32x1xf32>
    %50 = vector.extract_strided_slice %47 {offsets = [0, 0], sizes = [32, 1], strides = [1, 1]} : vector<32x3xf32> to vector<32x1xf32>
    %51 = vector.extract_strided_slice %45 {offsets = [0, 0], sizes = [1, 128], strides = [1, 1]} : vector<3x128xf32> to vector<1x128xf32>
    %52 = vector.broadcast %50 : vector<32x1xf32> to vector<32x128xf32>
    %53 = vector.broadcast %51 : vector<1x128xf32> to vector<32x128xf32>
    %54 = arith.mulf %52, %53 : vector<32x128xf32>
    %55 = vector.broadcast %49 : vector<32x1xf32> to vector<32x128xf32>
    %56 = arith.addf %55, %54 : vector<32x128xf32>
    %57 = vector.extract_strided_slice %47 {offsets = [0, 1], sizes = [32, 1], strides = [1, 1]} : vector<32x3xf32> to vector<32x1xf32>
    %58 = vector.extract_strided_slice %45 {offsets = [1, 0], sizes = [1, 128], strides = [1, 1]} : vector<3x128xf32> to vector<1x128xf32>
    %59 = vector.broadcast %57 : vector<32x1xf32> to vector<32x128xf32>
    %60 = vector.broadcast %58 : vector<1x128xf32> to vector<32x128xf32>
    %61 = arith.mulf %59, %60 : vector<32x128xf32>
    %62 = arith.addf %56, %61 : vector<32x128xf32>
    %63 = vector.extract_strided_slice %47 {offsets = [0, 2], sizes = [32, 1], strides = [1, 1]} : vector<32x3xf32> to vector<32x1xf32>
    %64 = vector.extract_strided_slice %45 {offsets = [2, 0], sizes = [1, 128], strides = [1, 1]} : vector<3x128xf32> to vector<1x128xf32>
    %65 = vector.broadcast %63 : vector<32x1xf32> to vector<32x128xf32>
    %66 = vector.broadcast %64 : vector<1x128xf32> to vector<32x128xf32>
    %67 = arith.mulf %65, %66 : vector<32x128xf32>
    %68 = arith.addf %62, %67 : vector<32x128xf32>
    %69 = arith.negf %68 : vector<32x128xf32>
    %70 = math.exp %69 : vector<32x128xf32>
    %cst_23 = arith.constant 1.000000e+00 : f32
    %71 = vector.broadcast %cst_23 : f32 to vector<32x128xf32>
    %72 = arith.addf %71, %70 : vector<32x128xf32>
    %73 = arith.divf %71, %72 : vector<32x128xf32>
    %c0_24 = arith.constant 0 : index
    %c128_25 = arith.constant 128 : index
    %74 = vector.load %arg1[%c0_24, %c128_25] : memref<8x256xf32, #tpu.memory_space<vmem>>, vector<8x128xf32>
    %c1_26 = arith.constant 1 : index
    %c0_27 = arith.constant 0 : index
    %c0_28 = arith.constant 0 : index
    %75 = vector.load %arg4[%c1_26, %c0_27, %c0_28] : memref<2x8x1xf32, #tpu.memory_space<vmem>>, vector<1x8x1xf32>
    %76 = vector.shape_cast %75 : vector<1x8x1xf32> to vector<8x1xf32>
    %77 = vector.extract_strided_slice %73 {offsets = [0, 0], sizes = [8, 128], strides = [1, 1]} : vector<32x128xf32> to vector<8x128xf32>
    %cst_29 = arith.constant 1.600000e+01 : f32
    %78 = vector.broadcast %cst_29 : f32 to vector<8x128xf32>
    %79 = arith.mulf %77, %78 : vector<8x128xf32>
    %80 = arith.addf %79, %74 : vector<8x128xf32>
    %c0_30 = arith.constant 0 : index
    %c128_31 = arith.constant 128 : index
    %81 = vector.load %arg5[%c0_30, %c128_31] : memref<32x256xf32, #tpu.memory_space<vmem>>, vector<8x128xf32>
    tpu.vector_store %arg5[%c0_30, %c128_31], %80 {strides = array<i32>} : memref<32x256xf32, #tpu.memory_space<vmem>>, vector<8x128xf32>,
    %82 = vector.extract_strided_slice %73 {offsets = [8, 0], sizes = [8, 128], strides = [1, 1]} : vector<32x128xf32> to vector<8x128xf32>
    %83 = vector.extract_strided_slice %73 {offsets = [8, 0], sizes = [8, 128], strides = [1, 1]} : vector<32x128xf32> to vector<8x128xf32>
    %84 = arith.mulf %82, %83 : vector<8x128xf32>
    %85 = vector.broadcast %76 : vector<8x1xf32> to vector<8x128xf32>
    %86 = arith.mulf %84, %85 : vector<8x128xf32>
    %c8_32 = arith.constant 8 : index
    %c128_33 = arith.constant 128 : index
    %87 = vector.load %arg5[%c8_32, %c128_33] : memref<32x256xf32, #tpu.memory_space<vmem>>, vector<8x128xf32>
    tpu.vector_store %arg5[%c8_32, %c128_33], %86 {strides = array<i32>} : memref<32x256xf32, #tpu.memory_space<vmem>>, vector<8x128xf32>,
    %88 = vector.extract_strided_slice %73 {offsets = [16, 0], sizes = [16, 128], strides = [1, 1]} : vector<32x128xf32> to vector<16x128xf32>
    %c16_34 = arith.constant 16 : index
    %c128_35 = arith.constant 128 : index
    %89 = vector.load %arg5[%c16_34, %c128_35] : memref<32x256xf32, #tpu.memory_space<vmem>>, vector<16x128xf32>
    tpu.vector_store %arg5[%c16_34, %c128_35], %88 {strides = array<i32>} : memref<32x256xf32, #tpu.memory_space<vmem>>, vector<16x128xf32>,
    return
  }
}

</mosaic_0001>

<bundles_post_ra>
// kernel: tile.33
= control target key start
LH: loop header
LB: loop body
LE: loop exit
PB: predicated region body
PF: predicated region fallthrough
CT: control target
= control target key end

     0   :  { %s22_s0 = inlined_call_operand.vmem [shape: f32[4], index: 0, kind: input, shape index: {}]   ;;  %s23_s1 = inlined_call_operand.vmem [shape: f32[2,4], index: 1, kind: output, shape index: {}]  }
   0x1   :  { %v4_v0 = vld [vmem:[%s22_s0] ss:$0 sm:$0xff] }
   0x2   :  { %5 = vst [vmem:[%s23_s1] sm:$0x3] %v4_v0 }

// kernel: tile.34
= control target key start
LH: loop header
LB: loop body
LE: loop exit
PB: predicated region body
PF: predicated region fallthrough
CT: control target
= control target key end

     0   :  { %vm8_vm0 = vcmask 31744   ;;  %vm14_vm1 = vcmask 64544   ;;  %s42_s0 = inlined_call_operand.vmem [shape: f32[2,4], index: 0, kind: input, shape index: {}]   ;;  %s43_s1 = inlined_call_operand.vmem [shape: f32[8], index: 1, kind: output, shape index: {}]  }
   0x1   :  { %v5_v0 = vld [vmem:[%s42_s0] sm:$0x3]  ;;  %s25_s0 = smov 4  }
   0x2   :  { %6 = vst [vmem:[#allocation1] sm:$0x3] %v5_v0 }
   0x9   :  { %v11_v1 = vld [vmem:[#allocation1 + $0x1] sm:$0x1]   ;;  %v7_v2 = vld [vmem:[#allocation1] sm:$0x1]  }
   0xa   :  { %12 = vrot.lane.b32.xlu0 %v11_v1, %s25_s0  ;;  %9 = vst.msk [vmem:[#allocation0] sm:$0x1] %vm8_vm0, %v7_v2  }
  0x7c   :  { %v13_v3 = vpop.permute.xlu0 %12  }
  0x7d   :  { %15 = vst.msk [vmem:[#allocation0] sm:$0x1] %vm14_vm1, %v13_v3  }
  0x84   :  { %v20_v4 = vld [vmem:[#allocation0] sm:$0x1] }
  0x85   :  { %23 = vst [vmem:[%s43_s1] sm:$0x1] %v20_v4 }

// kernel: tile.23
= control target key start
LH: loop header
LB: loop body
LE: loop exit
PB: predicated region body
PF: predicated region fallthrough
CT: control target
= control target key end

     0   :  { %s22_s0 = inlined_call_operand.vmem [shape: f32[16], index: 0, kind: input, shape index: {}]   ;;  %s23_s1 = inlined_call_operand.vmem [shape: f32[2,16], index: 1, kind: output, shape index: {}]  }
   0x1   :  { %v4_v0 = vld [vmem:[%s22_s0] ss:$0 sm:$0xff] }
   0x2   :  { %5 = vst [vmem:[%s23_s1] sm:$0x3] %v4_v0 }

// kernel: tile.24
= control target key start
LH: loop header
LB: loop body
LE: loop exit
PB: predicated region body
PF: predicated region fallthrough
CT: control target
= control target key end

     0   :  { %vm8_vm0 = vcmask 130048   ;;  %vm14_vm1 = vcmask 261248   ;;  %s42_s0 = inlined_call_operand.vmem [shape: f32[2,16], index: 0, kind: input, shape index: {}]   ;;  %s43_s1 = inlined_call_operand.vmem [shape: f32[32], index: 1, kind: output, shape index: {}]  }
   0x1   :  { %v5_v0 = vld [vmem:[%s42_s0] sm:$0x3]  ;;  %s25_s0 = smov 16  }
   0x2   :  { %6 = vst [vmem:[#allocation1] sm:$0x3] %v5_v0 }
   0x9   :  { %v11_v1 = vld [vmem:[#allocation1 + $0x1] sm:$0x1]   ;;  %v7_v2 = vld [vmem:[#allocation1] sm:$0x1]  }
   0xa   :  { %12 = vrot.lane.b32.xlu0 %v11_v1, %s25_s0  ;;  %9 = vst.msk [vmem:[#allocation0] sm:$0x1] %vm8_vm0, %v7_v2  }
  0x7c   :  { %v13_v3 = vpop.permute.xlu0 %12  }
  0x7d   :  { %15 = vst.msk [vmem:[#allocation0] sm:$0x1] %vm14_vm1, %v13_v3  }
  0x84   :  { %v20_v4 = vld [vmem:[#allocation0] sm:$0x1] }
  0x85   :  { %23 = vst [vmem:[%s43_s1] sm:$0x1] %v20_v4 }

// kernel: custom-call.1
= control target key start
LH: loop header
LB: loop body
LE: loop exit
PB: predicated region body
PF: predicated region fallthrough
CT: control target
= control target key end

     0   :  { %s6_s0 = inlined_call_operand.vmem [shape: f32[27,8], index: 0, kind: output, shape index: {}]  }

// kernel: custom-call
= control target key start
LH: loop header
LB: loop body
LE: loop exit
PB: predicated region body
PF: predicated region fallthrough
CT: control target
= control target key end

     0   :  { %s6_s0 = inlined_call_operand.vmem [shape: f32[27,32], index: 0, kind: output, shape index: {}]  }

// kernel: yolo_forward.1
= control target key start
LH: loop header
LB: loop body
LE: loop exit
PB: predicated region body
PF: predicated region fallthrough
CT: control target
= control target key end

     0   :  { %v407_v0 = vmov 1   ;;  %v408_v1 = vmov 0   ;;  %v409_v16 = vmov 2   ;;  %v49_v31 = vlaneseq  ;;  %s590_s2 = inlined_call_operand.vmem [shape: f32[2,32,3], index: 2, kind: input, shape index: {}]   ;;  %s591_s3 = inlined_call_operand.vmem [shape: f32[2,32,1], index: 3, kind: input, shape index: {}]   ;;  %s592_s4 = inlined_call_operand.vmem [shape: f32[2,8,1], index: 4, kind: input, shape index: {}]   ;;  %s593_s0 = inlined_call_operand.vmem [shape: f32[3,256], index: 0, kind: input, shape index: {}]   ;;  %s594_s1 = inlined_call_operand.vmem [shape: f32[8,256], index: 1, kind: input, shape index: {}]   ;;  %s595_s5 = inlined_call_operand.vmem [shape: f32[32,256], index: 5, kind: output, shape index: {}]  }
   0x1   :  { %360 = vset.pattern.permute.xlu0 %v407_v0  ;;  %359 = vset.pattern.permute.xlu1 %v408_v1  ;;  %v23_v2 = vld [vmem:[%s590_s2 + $0x10] sm:$0xff]  ;;  %v21_v3 = vld [vmem:[%s590_s2] sm:$0xff]  ;;  %v24_v4 = vld [vmem:[%s590_s2 + $0x18] sm:$0xff] }
   0x2   :  { %41 = vperm.xlu1 %359, %v23_v2   ;;  %82 = vperm.xlu0 %360, %v21_v3   ;;  %v26_v5 = vld [vmem:[%s591_s3 + $0x8] sm:$0xff]  ;;  %v28_v6 = vld [vmem:[%s591_s3 + $0x18] sm:$0xff]  ;;  %v25_v9 = vld [vmem:[%s591_s3] sm:$0xff]  ;;  %v50_v34 = vshrl.u32 %v49_v31, 7 }
   0x3   :  { %v22_v7 = vld [vmem:[%s590_s2 + $0x8] sm:$0xff]  ;;  %v27_v10 = vld [vmem:[%s591_s3 + $0x10] sm:$0xff]  ;;  %v343_v11 = vld [vmem:[%s590_s2 + $0x20] sm:$0xff] }
   0x4   :  { %v344_v8 = vld [vmem:[%s590_s2 + $0x28] sm:$0xff]  ;;  %v347_v12 = vld [vmem:[%s591_s3 + $0x20] sm:$0xff]  ;;  %v346_v14 = vld [vmem:[%s590_s2 + $0x38] sm:$0xff]  ;;  %v51_v37 = vsub.s32 0, %v50_v34  ;;  %v99_v38 = vsub.s32 1, %v50_v34  ;;  %v127_v45 = vsub.s32 2, %v50_v34 }
   0x5   :  { %v348_v13 = vld [vmem:[%s591_s3 + $0x28] sm:$0xff]  ;;  %v350_v15 = vld [vmem:[%s591_s3 + $0x38] sm:$0xff]  ;;  %v345_v17 = vld [vmem:[%s590_s2 + $0x30] sm:$0xff] }
   0x6   :  { %46 = vperm.xlu1 %359, %v24_v4   ;;  %90 = vperm.xlu0 %360, %v23_v2   ;;  %v355_v18 = vld [vmem:[%s592_s4 + $0x8] sm:$0xff]  ;;  %v349_v19 = vld [vmem:[%s591_s3 + $0x30] sm:$0xff]  ;;  %v162_v20 = vld [vmem:[%s592_s4] sm:$0xff] }
   0x7   :  { %v20_v40 = vld [vmem:[%s593_s0] sm:$0x7]  ;;  %v176_v54 = vld [vmem:[%s593_s0 + $0x4] sm:$0x7] }
   0x8   :  { %v513_v42 = vrot.slane %v20_v40, %v51_v37  ;;  %v515_v43 = vrot.slane %v20_v40, %v99_v38  ;;  %v524_v51 = vrot.slane %v20_v40, %v127_v45  ;;  %v533_v61 = vrot.slane %v176_v54, %v51_v37 }
   0x9   :  { %v535_v62 = vrot.slane %v176_v54, %v99_v38 }
   0xa   :  { %64 = vperm.xlu1 %359, %v26_v5   ;;  %367 = vset.pattern.permute.xlu0 %v408_v1 }
   0xb   :  { %31 = vperm.xlu0 %367, %v21_v3  }
   0xe   :  { %74 = vperm.xlu1 %359, %v28_v6  }
   0xf   :  { %36 = vperm.xlu0 %367, %v22_v7  }
  0x12   :  { %194 = vperm.xlu1 %359, %v344_v8  }
  0x13   :  { %59 = vperm.xlu0 %367, %v25_v9   ;;  %v539_v9 = vrot.slane %v176_v54, %v127_v45 }
  0x16   :  { %361 = vset.pattern.permute.xlu1 %v407_v0 }
  0x17   :  { %86 = vperm.xlu1 %361, %v22_v7   ;;  %69 = vperm.xlu0 %367, %v27_v10  }
  0x1b   :  { %362 = vset.pattern.permute.xlu1 %v408_v1  ;;  %189 = vperm.xlu0 %367, %v343_v11  }
  0x1c   :  { %217 = vperm.xlu1 %362, %v347_v12  }
  0x1f   :  { %222 = vperm.xlu0 %367, %v348_v13  }
  0x20   :  { %363 = vset.pattern.permute.xlu1 %v407_v0 }
  0x21   :  { %240 = vperm.xlu1 %363, %v343_v11  }
  0x23   :  { %204 = vperm.xlu0 %367, %v346_v14  }
  0x25   :  { %244 = vperm.xlu1 %363, %v344_v8  }
  0x27   :  { %232 = vperm.xlu0 %367, %v350_v15  }
  0x29   :  { %364 = vset.pattern.permute.xlu1 %v409_v16 }
  0x2a   :  { %114 = vperm.xlu1 %364, %v22_v7  }
  0x2b   :  { %370 = vset.pattern.permute.xlu0 %v409_v16 }
  0x2c   :  { %110 = vperm.xlu0 %370, %v21_v3  }
  0x2e   :  { %365 = vset.pattern.permute.xlu1 %v408_v1 }
  0x2f   :  { %199 = vperm.xlu1 %365, %v345_v17  }
  0x30   :  { %118 = vperm.xlu0 %370, %v23_v2  }
  0x33   :  { %366 = vset.pattern.permute.xlu1 %v409_v16 }
  0x34   :  { %268 = vperm.xlu1 %366, %v343_v11   ;;  %280 = vperm.xlu0 %370, %v346_v14  }
  0x38   :  { %272 = vperm.xlu1 %366, %v344_v8   ;;  %374 = vset.pattern.permute.xlu0 %v408_v1 }
  0x39   :  { %328 = vperm.xlu0 %374, %v355_v18  }
  0x3c   :  { %368 = vset.pattern.permute.xlu1 %v407_v0 }
  0x3d   :  { %94 = vperm.xlu1 %368, %v24_v4  }
  0x41   :  { %369 = vset.pattern.permute.xlu1 %v408_v1 }
  0x42   :  { %227 = vperm.xlu1 %369, %v349_v19  }
  0x46   :  { %371 = vset.pattern.permute.xlu1 %v407_v0 }
  0x47   :  { %248 = vperm.xlu1 %371, %v345_v17  }
  0x4b   :  { %252 = vperm.xlu1 %371, %v346_v14  }
  0x4f   :  { %372 = vset.pattern.permute.xlu1 %v409_v16 }
  0x50   :  { %122 = vperm.xlu1 %372, %v24_v4  }
  0x54   :  { %276 = vperm.xlu1 %372, %v345_v17  }
  0x58   :  { %373 = vset.pattern.permute.xlu1 %v408_v1 }
  0x59   :  { %169 = vperm.xlu1 %373, %v162_v20  }
  0x7d   :  { %v42_v21 = vpop.permute.xlu1 %41  ;;  %v83_v22 = vpop.permute.xlu0 %82 }
  0x7e   :  { %v101_v52 = vmul.f32 %v515_v43, %v83_v22  ;;  %v55_v57 = vmul.f32 %v513_v42, %v42_v21 }
  0x81   :  { %v506_v23 = vpop.permute.xlu1 %46  ;;  %v91_v24 = vpop.permute.xlu0 %90 }
  0x82   :  { %v103_v60 = vmul.f32 %v515_v43, %v91_v24 }
  0x85   :  { %v65_v25 = vpop.permute.xlu1 %64 }
  0x86   :  { %v32_v26 = vpop.permute.xlu0 %31 }
  0x87   :  { %v53_v46 = vmul.f32 %v513_v42, %v32_v26 }
  0x89   :  { %v508_v27 = vpop.permute.xlu1 %74 }
  0x8a   :  { %v37_v28 = vpop.permute.xlu0 %36 }
  0x8b   :  { %v54_v47 = vmul.f32 %v513_v42, %v37_v28 }
  0x8d   :  { %v195_v29 = vpop.permute.xlu1 %194  ;;  %v78_v53 = vadd.f32 %v65_v25, %v54_v47 }
  0x8e   :  { %v60_v30 = vpop.permute.xlu0 %59  ;;  %v212_v16 = vmul.f32 %v533_v61, %v195_v29 }
  0x8f   :  { %v77_v55 = vadd.f32 %v60_v30, %v53_v46 }
  0x91   :  { %v105_v0 = vadd.f32 %v101_v52, %v77_v55  ;;  %v56_v55 = vmul.f32 %v513_v42, %v506_v23 }
  0x92   :  { %v87_v32 = vpop.permute.xlu1 %86  ;;  %v70_v33 = vpop.permute.xlu0 %69 }
  0x93   :  { %v102_v49 = vmul.f32 %v515_v43, %v87_v32  ;;  %v79_v1 = vadd.f32 %v70_v33, %v55_v57 }
  0x95   :  { %v106_v58 = vadd.f32 %v102_v49, %v78_v53  ;;  %v107_v10 = vadd.f32 %v103_v60, %v79_v1  ;;  %v161_v60 = vld [vmem:[%s594_s1] sm:$0xff] }
  0x96   :  { %v190_v35 = vpop.permute.xlu0 %189 }
  0x97   :  { %v218_v36 = vpop.permute.xlu1 %217  ;;  %v211_v4 = vmul.f32 %v533_v61, %v190_v35 }
  0x99   :  { %v235_v14 = vadd.f32 %v218_v36, %v211_v4 }
  0x9a   :  { %v223_v39 = vpop.permute.xlu0 %222 }
  0x9b   :  { %v236_v22 = vadd.f32 %v223_v39, %v212_v16 }
  0x9c   :  { %v241_v41 = vpop.permute.xlu1 %240 }
  0x9d   :  { %v259_v11 = vmul.f32 %v535_v62, %v241_v41 }
  0x9e   :  { %v517_v44 = vpop.permute.xlu0 %204 }
  0x9f   :  { %v263_v18 = vadd.f32 %v259_v11, %v235_v14  ;;  %v214_v45 = vmul.f32 %v533_v61, %v517_v44  ;;  %v80_v44 = vadd.f32 %v508_v27, %v56_v55  ;;  %v319_v11 = vld [vmem:[%s594_s1 + $0x8] sm:$0xff] }
  0xa0   :  { %v245_v48 = vpop.permute.xlu1 %244 }
  0xa1   :  { %v260_v19 = vmul.f32 %v535_v62, %v245_v48 }
  0xa2   :  { %v522_v50 = vpop.permute.xlu0 %232 }
  0xa3   :  { %v264_v26 = vadd.f32 %v260_v19, %v236_v22  ;;  %v238_v52 = vadd.f32 %v522_v50, %v214_v45 }
  0xa5   :  { %v115_v56 = vpop.permute.xlu1 %114 }
  0xa6   :  { %v130_v59 = vmul.f32 %v524_v51, %v115_v56 }
  0xa7   :  { %v111_v63 = vpop.permute.xlu0 %110 }
  0xa8   :  { %v134_v2 = vadd.f32 %v130_v59, %v106_v58  ;;  %v129_v3 = vmul.f32 %v524_v51, %v111_v63 }
  0xaa   :  { %v133_v5 = vadd.f32 %v129_v3, %v105_v0  ;;  %v200_v6 = vpop.permute.xlu1 %199  ;;  %v340_v7 = vmul.f32 -1.442695, %v134_v2 }
  0xab   :  { %v119_v8 = vpop.permute.xlu0 %118  ;;  %v213_v50 = vmul.f32 %v533_v61, %v200_v6 }
  0xac   :  { %v339_v12 = vmul.f32 -1.442695, %v133_v5  ;;  %v131_v13 = vmul.f32 %v524_v51, %v119_v8 }
  0xae   :  { %375 = vpow2.f32 %v339_v12  ;;  %v135_v15 = vadd.f32 %v131_v13, %v107_v10 }
  0xaf   :  { %377 = vpow2.f32 %v340_v7  ;;  %v269_v17 = vpop.permute.xlu1 %268  ;;  %v281_v47 = vpop.permute.xlu0 %280 }
  0xb0   :  { %v341_v20 = vmul.f32 -1.442695, %v135_v15  ;;  %v287_v21 = vmul.f32 %v539_v9, %v269_v17  ;;  %v290_v54 = vmul.f32 %v539_v9, %v281_v47 }
  0xb2   :  { %379 = vpow2.f32 %v341_v20  ;;  %v291_v24 = vadd.f32 %v287_v21, %v263_v18 }
  0xb3   :  { %v273_v25 = vpop.permute.xlu1 %272 }
  0xb4   :  { %v351_v28 = vmul.f32 -1.442695, %v291_v24  ;;  %v288_v30 = vmul.f32 %v539_v9, %v273_v25 }
  0xb6   :  { %381 = vpow2.f32 %v351_v28  ;;  %v292_v31 = vadd.f32 %v288_v30, %v264_v26 }
  0xb8   :  { %v352_v32 = vmul.f32 -1.442695, %v292_v31  ;;  %v95_v29 = vpop.permute.xlu1 %94 }
  0xb9   :  { %v104_v56 = vmul.f32 %v515_v43, %v95_v29 }
  0xba   :  { %383 = vpow2.f32 %v352_v32 }
  0xbb   :  { %v376_v33 = vpop.eup %375  ;;  %v108_v2 = vadd.f32 %v104_v56, %v80_v44 }
  0xbc   :  { %v378_v34 = vpop.eup %377  ;;  %v149_v35 = vadd.f32 1.0, %v376_v33 }
  0xbd   :  { %v228_v36 = vpop.permute.xlu1 %227  ;;  %v150_v38 = vadd.f32 1.0, %v378_v34 }
  0xbe   :  { %385 = vrcp.f32 %v149_v35  ;;  %v237_v4 = vadd.f32 %v228_v36, %v213_v50 }
  0xbf   :  { %v380_v37 = vpop.eup %379 }
  0xc0   :  { %v151_v39 = vadd.f32 1.0, %v380_v37 }
  0xc2   :  { %387 = vrcp.f32 %v151_v39  ;;  %v249_v40 = vpop.permute.xlu1 %248 }
  0xc3   :  { %v382_v41 = vpop.eup %381  ;;  %389 = vrcp.f32 %v150_v38  ;;  %v261_v23 = vmul.f32 %v535_v62, %v249_v40 }
  0xc4   :  { %v307_v46 = vadd.f32 1.0, %v382_v41 }
  0xc5   :  { %v265_v61 = vadd.f32 %v261_v23, %v237_v4 }
  0xc6   :  { %391 = vrcp.f32 %v307_v46  ;;  %v253_v48 = vpop.permute.xlu1 %252 }
  0xc7   :  { %v384_v49 = vpop.eup %383  ;;  %v262_v53 = vmul.f32 %v535_v62, %v253_v48 }
  0xc8   :  { %v308_v57 = vadd.f32 1.0, %v384_v49 }
  0xc9   :  { %v266_v58 = vadd.f32 %v262_v53, %v238_v52 }
  0xca   :  { %393 = vrcp.f32 %v308_v57 }
  0xcb   :  { %v386_v59 = vpop.eup %385  ;;  %v294_v63 = vadd.f32 %v290_v54, %v266_v58  ;;  %v123_v0 = vpop.permute.xlu1 %122 }
  0xcc   :  { %v163_v1 = vmul.f32 8.0, %v386_v59  ;;  %v132_v42 = vmul.f32 %v524_v51, %v123_v0 }
  0xcd   :  { %v354_v43 = vmul.f32 -1.442695, %v294_v63 }
  0xce   :  { %v164_v3 = vadd.f32 %v163_v1, %v161_v60  ;;  %v136_v27 = vadd.f32 %v132_v42, %v108_v2 }
  0xcf   :  { %v388_v5 = vpop.eup %387  ;;  %395 = vpow2.f32 %v354_v43  ;;  %v277_v7 = vpop.permute.xlu1 %276 }
  0xd0   :  { %v390_v8 = vpop.eup %389  ;;  %165 = vst [vmem:[%s595_s5] sm:$0xff] %v164_v3  ;;  %174 = vst [vmem:[%s595_s5 + $0x20] sm:$0xff] %v388_v5  ;;  %v342_v62 = vmul.f32 -1.442695, %v136_v27  ;;  %v289_v51 = vmul.f32 %v539_v9, %v277_v7  ;;  %v329_v9 = vpop.permute.xlu0 %328 }
  0xd1   :  { %v166_v12 = vmul.f32 %v390_v8, %v390_v8 }
  0xd2   :  { %397 = vpow2.f32 %v342_v62  ;;  %v293_v6 = vadd.f32 %v289_v51, %v265_v61 }
  0xd3   :  { %v392_v10 = vpop.eup %391 }
  0xd4   :  { %v322_v13 = vmul.f32 16.0, %v392_v10  ;;  %v353_v14 = vmul.f32 -1.442695, %v293_v6  ;;  %v170_v15 = vpop.permute.xlu1 %169 }
  0xd5   :  { %v172_v16 = vmul.f32 %v170_v15, %v166_v12 }
  0xd6   :  { %v323_v17 = vadd.f32 %v322_v13, %v319_v11  ;;  %399 = vpow2.f32 %v353_v14 }
  0xd7   :  { %v394_v18 = vpop.eup %393  ;;  %173 = vst [vmem:[%s595_s5 + $0x10] sm:$0xff] %v172_v16 }
  0xd8   :  { %324 = vst [vmem:[%s595_s5 + $0x8] sm:$0xff] %v323_v17  ;;  %v325_v19 = vmul.f32 %v394_v18, %v394_v18 }
  0xda   :  { %v331_v20 = vmul.f32 %v329_v9, %v325_v19 }
  0xdc   :  { %v396_v21 = vpop.eup %395  ;;  %332 = vst [vmem:[%s595_s5 + $0x18] sm:$0xff] %v331_v20 }
  0xdd   :  { %v310_v22 = vadd.f32 1.0, %v396_v21 }
  0xdf   :  { %v398_v24 = vpop.eup %397  ;;  %401 = vrcp.f32 %v310_v22 }
  0xe0   :  { %v152_v25 = vadd.f32 1.0, %v398_v24 }
  0xe2   :  { %403 = vrcp.f32 %v152_v25 }
  0xe3   :  { %v400_v26 = vpop.eup %399 }
  0xe4   :  { %v309_v28 = vadd.f32 1.0, %v400_v26 }
  0xe6   :  { %405 = vrcp.f32 %v309_v28 }
  0xec   :  { %v402_v30 = vpop.eup %401 }
  0xed   :  { %334 = vst [vmem:[%s595_s5 + $0x38] sm:$0xff] %v402_v30 }
  0xef   :  { %v404_v31 = vpop.eup %403 }
  0xf0   :  { %175 = vst [vmem:[%s595_s5 + $0x30] sm:$0xff] %v404_v31 }
  0xf3   :  { %v406_v32 = vpop.eup %405 }
  0xf4   :  { %333 = vst [vmem:[%s595_s5 + $0x28] sm:$0xff] %v406_v32 }

</bundles_post_ra>
